<compile_context>
chip_gen: v5e
topology: v5e:2x2
jax: 0.10.0
libtpu: 0.0.40
codegen_flags: <defaults>
</compile_context>

<pallas_src>
import functools
import math

import jax
import jax.numpy as jnp
from jax.experimental import pallas as pl
from jax.experimental.pallas import tpu as pltpu


# ---------------------------------------------------------------------------
# Pallas kernel: one SAGE layer, tiled over (node-row tiles i, node-col tiles k)
# ---------------------------------------------------------------------------
def sage_layer_kernel(x_i_ref, x_k_ref, p_ref, aem_ref,
                      wax_ref, wmw_ref, wew_ref,
                      out_ref, acc_ref):
    """acc = sum_k P[i,k] @ x[k]        (f32 accumulator over the node-column reduction)
       out = relu(x @ Wax + acc @ Wmw + aem @ Wew)      (biases folded into aem/Wew columns)."""
    k = pl.program_id(1)

    @pl.when(k == 0)
    def _():
        acc_ref[...] = jnp.zeros_like(acc_ref)

    # Reduction over node-column tiles (bf16 operands -> f32 accumulation on the MXU).
    acc_ref[...] += jnp.dot(p_ref[...], x_k_ref[...],
                            preferred_element_type=jnp.float32)

    @pl.when(k == pl.num_programs(1) - 1)
    def _():
        px = acc_ref[...].astype(jnp.bfloat16)                                    # [tm, Dinp]
        h = (jnp.dot(x_i_ref[...], wax_ref[...], preferred_element_type=jnp.float32)
             + jnp.dot(px, wmw_ref[...], preferred_element_type=jnp.float32)
             + jnp.dot(aem_ref[...], wew_ref[...], preferred_element_type=jnp.float32))
        out_ref[...] = jnp.maximum(h, 0.0).astype(out_ref.dtype)                  # [tm, Doutp]


def sage_layer(x_p, P_p, aem_p, wax, wmw, wew, *, tm=128, tk=128):
    """One SAGELayer on padded, bf16 inputs.  Grid: (node-row tiles, node-col reduction tiles)."""
    np_, dinp = x_p.shape
    dep = aem_p.shape[1]
    doutp = wax.shape[1]
    assert np_ % tm == 0 and np_ % tk == 0 and tk % 128 == 0 and tm % 8 == 0
    assert dinp % 128 == 0 and dep % 128 == 0 and doutp % 128 == 0

    grid = (np_ // tm, np_ // tk)
    return pl.pallas_call(
        sage_layer_kernel,
        out_shape=jax.ShapeDtypeStruct((np_, doutp), jnp.bfloat16),
        grid_spec=pltpu.PrefetchScalarGridSpec(
            num_scalar_prefetch=0,
            grid=grid,
            in_specs=[
                pl.BlockSpec((tm, dinp), lambda i, k: (i, 0)),       # x  (row tile, update path)
                pl.BlockSpec((tk, dinp), lambda i, k: (k, 0)),       # x  (col tile, P @ x)
                pl.BlockSpec((tm, tk),   lambda i, k: (i, k)),       # P
                pl.BlockSpec((tm, dep),  lambda i, k: (i, 0)),       # [Ae | mask | 1]
                pl.BlockSpec((dinp, doutp), lambda i, k: (0, 0)),    # Wax
                pl.BlockSpec((dinp, doutp), lambda i, k: (0, 0)),    # Wmw  = Wmx @ Waa
                pl.BlockSpec((dep, doutp),  lambda i, k: (0, 0)),    # Wew  = [Wme;bm]@Waa ; ba
            ],
            out_specs=pl.BlockSpec((tm, doutp), lambda i, k: (i, 0)),
            scratch_shapes=[pltpu.VMEM((tm, dinp), jnp.float32)],    # f32 accumulator for P @ x
        ),
        compiler_params=pltpu.CompilerParams(
            dimension_semantics=("parallel", "arbitrary"),
            vmem_limit_bytes=32 * 1024 * 1024,
        ),
    )(x_p, x_p, P_p, aem_p, wax, wmw, wew)


# ---------------------------------------------------------------------------
# JAX-side glue: layer-invariant precompute, padding, weight folding
# ---------------------------------------------------------------------------
def round_up(a, m):
    return (a + m - 1) // m * m


def pad_to(arr, shape):
    return jnp.pad(arr, [(0, s - d) for d, s in zip(arr.shape, shape)])


def graph_precompute(edge_index, edge_attr, num_nodes, dep):
    """Dense mean-aggregation operators, built sparsely (no [E, N] materialization)."""
    src, dst = edge_index[0], edge_index[1]
    de = edge_attr.shape[1]
    deg = jnp.zeros((num_nodes,), jnp.float32).at[dst].add(1.0)
    inv_deg = jnp.where(deg > 0, 1.0 / jnp.maximum(deg, 1.0), 0.0)
    # P[i, j] = (#edges j -> i) / deg(i)
    P = jnp.zeros((num_nodes, num_nodes), jnp.float32).at[dst, src].add(1.0) * inv_deg[:, None]
    # Ae[i] = mean of incoming edge features of node i (0 if isolated)
    Ae = jnp.zeros((num_nodes, de), jnp.float32).at[dst].add(edge_attr) * inv_deg[:, None]
    mask = (deg > 0).astype(jnp.float32)                 # pairs with the bm weight row
    aem = jnp.zeros((num_nodes, dep), jnp.float32)
    aem = aem.at[:, :de].set(Ae).at[:, de].set(mask).at[:, de + 1].set(1.0)   # 1-col pairs with ba
    return P, aem


def pack_layer_params(p, dinp, dep, doutp):
    """Zero-pad, bf16-cast, and fold the message weights through W_apply's aggr block (exact:
    message is linear and the activation sits after W_apply)."""
    din, dout = p["wmx"].shape
    de = p["wme"].shape[0]
    wax = pad_to(p["wax"], (dinp, doutp)).astype(jnp.bfloat16)
    wmw = pad_to(p["wmx"] @ p["waa"], (dinp, doutp)).astype(jnp.bfloat16)
    wew = jnp.zeros((dep, doutp), jnp.float32)
    wew = wew.at[:de, :dout].set(p["wme"] @ p["waa"])     # edge features (through Waa)
    wew = wew.at[de, :dout].set((p["bm"] @ p["waa"])[0])  # message bias (masked by deg>0 column)
    wew = wew.at[de + 1, :dout].set(p["ba"][0])           # apply bias (ones column)
    wew = wew.astype(jnp.bfloat16)
    return wax, wmw, wew


def init_layer_params(key, ndim_in, edim, ndim_out):
    """Synthetic deterministic init.  W_msg: Linear(ndim_in+edim, ndim_out) split into (wmx, wme);
    W_apply: Linear(ndim_in+ndim_out, ndim_out) split into (wax, waa)."""
    k1, k2, k3, k4, k5, k6 = jax.random.split(key, 6)
    sc_m = 1.0 / jnp.sqrt(ndim_in + edim)
    sc_a = 1.0 / jnp.sqrt(ndim_in + ndim_out)
    return {
        "wmx": jax.random.uniform(k1, (ndim_in, ndim_out), jnp.float32, -sc_m, sc_m),
        "wme": jax.random.uniform(k2, (edim, ndim_out), jnp.float32, -sc_m, sc_m),
        "bm":  jax.random.uniform(k3, (1, ndim_out), jnp.float32, -sc_m, sc_m),
        "wax": jax.random.uniform(k4, (ndim_in, ndim_out), jnp.float32, -sc_a, sc_a),
        "waa": jax.random.uniform(k5, (ndim_out, ndim_out), jnp.float32, -sc_a, sc_a),
        "ba":  jax.random.uniform(k6, (1, ndim_out), jnp.float32, -sc_a, sc_a),
    }


@functools.partial(jax.jit, static_argnames=("tm", "tk"))
def sage_forward(x, edge_index, edge_attr, params_l1, params_l2, *, tm=128, tk=128):
    N, din = x.shape
    de = edge_attr.shape[1]
    hidden = params_l1["wmx"].shape[1]
    dout = params_l2["wmx"].shape[1]

    dinp = round_up(din, 128)
    dep = round_up(de + 2, 128)            # +mask column (bm) and +ones column (ba)
    hidp = round_up(hidden, 128)
    doutp = round_up(dout, 128)            # lane-dense layer-2 output (32 -> 128), sliced below
    np_ = round_up(N, math.lcm(tm, tk))

    # Layer-invariant precompute, paid once for both layers.
    P, aem = graph_precompute(edge_index, edge_attr, N, dep)
    P_p = pad_to(P, (np_, np_)).astype(jnp.bfloat16)
    aem_p = pad_to(aem, (np_, dep)).astype(jnp.bfloat16)
    x_p = pad_to(x, (np_, dinp)).astype(jnp.bfloat16)

    w1 = pack_layer_params(params_l1, dinp, dep, hidp)
    w2 = pack_layer_params(params_l2, hidp, dep, doutp)

    h = sage_layer(x_p, P_p, aem_p, *w1, tm=tm, tk=tk)      # [Np, 128] bf16, stays on device
    # nn.Dropout is identity in eval / inference mode.
    h2 = sage_layer(h, P_p, aem_p, *w2, tm=tm, tk=tk)       # [Np, 128] (padded)
    return h2[:N, :dout].astype(jnp.float32)


# ---------------------------------------------------------------------------
# Pure-JAX f32 reference (PyG semantics) for a correctness check
# ---------------------------------------------------------------------------
def sage_layer_reference(x, edge_index, edge_attr, p):
    src, dst = edge_index[0], edge_index[1]
    N = x.shape[0]
    msg = x[src] @ p["wmx"] + edge_attr @ p["wme"] + p["bm"]
    deg = jnp.zeros((N,), jnp.float32).at[dst].add(1.0)
    aggr = jnp.zeros((N, msg.shape[1]), jnp.float32).at[dst].add(msg)
    aggr = aggr / jnp.maximum(deg, 1.0)[:, None]
    return jnp.maximum(x @ p["wax"] + aggr @ p["waa"] + p["ba"], 0.0)


def sage_reference(x, edge_index, edge_attr, p1, p2):
    h = sage_layer_reference(x, edge_index, edge_attr, p1)
    return sage_layer_reference(h, edge_index, edge_attr, p2)


if __name__ == "__main__":
    N, E = 200, 600
    NDIM_IN, EDIM, NDIM_OUT, HIDDEN = 16, 8, 32, 128

    root = jax.random.PRNGKey(0)
    kx, ke, ksrc, kdst, kp1, kp2 = jax.random.split(root, 6)

    x = jax.random.normal(kx, (N, NDIM_IN), jnp.float32)
    edge_attr = jax.random.normal(ke, (E, EDIM), jnp.float32)
    edge_index = jnp.stack([
        jax.random.randint(ksrc, (E,), 0, N),
        jax.random.randint(kdst, (E,), 0, N),
    ], axis=0)                                           # [2, E] int32

    params_l1 = init_layer_params(kp1, NDIM_IN, EDIM, HIDDEN)
    params_l2 = init_layer_params(kp2, HIDDEN, EDIM, NDIM_OUT)

    out = sage_forward(x, edge_index, edge_attr, params_l1, params_l2)
    out = jax.block_until_ready(out)
    assert out.shape == (N, NDIM_OUT), out.shape
    assert bool(jnp.all(jnp.isfinite(out)))

    # bf16 kernel vs f32 reference: typically <2% of the output scale.
    ref = sage_reference(x, edge_index, edge_attr, params_l1, params_l2)
    rel_err = float(jnp.max(jnp.abs(out - ref)) / (jnp.max(jnp.abs(ref)) + 1e-6))
    assert rel_err < 1e-1, rel_err

    print("KERNEL_OK")
</pallas_src>

<mosaic_0001>
module attributes {stable_mosaic.version = 11 : i64} {
  func.func @sage_layer_kernel(%arg0: i32, %arg1: i32, %arg2: memref<128x128xbf16, #tpu.memory_space<vmem>>, %arg3: memref<128x128xbf16, #tpu.memory_space<vmem>>, %arg4: memref<128x128xbf16, #tpu.memory_space<vmem>>, %arg5: memref<128x128xbf16, #tpu.memory_space<vmem>>, %arg6: memref<128x128xbf16, #tpu.memory_space<vmem>>, %arg7: memref<128x128xbf16, #tpu.memory_space<vmem>>, %arg8: memref<128x128xbf16, #tpu.memory_space<vmem>>, %arg9: memref<128x128xbf16, #tpu.memory_space<vmem>>, %arg10: memref<128x128xf32, #tpu.memory_space<vmem>>) attributes {dimension_semantics = [#tpu.dimension_semantics<parallel>, #tpu.dimension_semantics<arbitrary>], iteration_bounds = array<i64: 2, 2>, scalar_prefetch = 0 : i64, scratch_operands = 1 : i64, tpu.core_type = #tpu.core_type<tc>, window_params = [{transform_indices = @transform_0, window_bounds = array<i64: 128, 128>}, {transform_indices = @transform_1, window_bounds = array<i64: 128, 128>}, {transform_indices = @transform_2, window_bounds = array<i64: 128, 128>}, {transform_indices = @transform_3, window_bounds = array<i64: 128, 128>}, {pipeline_mode = #tpu.pipeline_mode<synchronous>, transform_indices = @transform_4, window_bounds = array<i64: 128, 128>}, {pipeline_mode = #tpu.pipeline_mode<synchronous>, transform_indices = @transform_5, window_bounds = array<i64: 128, 128>}, {pipeline_mode = #tpu.pipeline_mode<synchronous>, transform_indices = @transform_6, window_bounds = array<i64: 128, 128>}, {transform_indices = @transform_7, window_bounds = array<i64: 128, 128>}]} {
    %c0_i32 = arith.constant 0 : i32
    %0 = arith.cmpi eq, %arg1, %c0_i32 : i32
    %1 = arith.extui %0 : i1 to i32
    %c0_i32_0 = arith.constant 0 : i32
    %2 = arith.cmpi ne, %1, %c0_i32_0 : i32
    scf.if %2 {
      %cst_9 = arith.constant 0.000000e+00 : f32
      %12 = vector.broadcast %cst_9 : f32 to vector<128x128xf32>
      %c0_10 = arith.constant 0 : index
      %c0_11 = arith.constant 0 : index
      %13 = vector.load %arg10[%c0_10, %c0_11] : memref<128x128xf32, #tpu.memory_space<vmem>>, vector<128x128xf32>
      tpu.vector_store %arg10[%c0_10, %c0_11], %12 {strides = array<i32>} : memref<128x128xf32, #tpu.memory_space<vmem>>, vector<128x128xf32>,
    } else {
    }
    %c0 = arith.constant 0 : index
    %c0_1 = arith.constant 0 : index
    %3 = vector.load %arg10[%c0, %c0_1] : memref<128x128xf32, #tpu.memory_space<vmem>>, vector<128x128xf32>
    %c0_2 = arith.constant 0 : index
    %c0_3 = arith.constant 0 : index
    %4 = vector.load %arg4[%c0_2, %c0_3] : memref<128x128xbf16, #tpu.memory_space<vmem>>, vector<128x128xbf16>
    %c0_4 = arith.constant 0 : index
    %c0_5 = arith.constant 0 : index
    %5 = vector.load %arg3[%c0_4, %c0_5] : memref<128x128xbf16, #tpu.memory_space<vmem>>, vector<128x128xbf16>
    %cst = arith.constant dense<0.000000e+00> : vector<128x128xf32>
    %6 = tpu.matmul %4, %5, %cst {dimension_numbers = #tpu.dot_dimension_numbers<[1], [0], [0], [1], [0, 0, 1, 1], [], []>} : vector<128x128xbf16>, vector<128x128xbf16>, vector<128x128xf32> -> vector<128x128xf32>
    %7 = arith.addf %3, %6 : vector<128x128xf32>
    %c0_6 = arith.constant 0 : index
    %c0_7 = arith.constant 0 : index
    %8 = vector.load %arg10[%c0_6, %c0_7] : memref<128x128xf32, #tpu.memory_space<vmem>>, vector<128x128xf32>
    tpu.vector_store %arg10[%c0_6, %c0_7], %7 {strides = array<i32>} : memref<128x128xf32, #tpu.memory_space<vmem>>, vector<128x128xf32>,
    %c1_i32 = arith.constant 1 : i32
    %9 = arith.cmpi eq, %arg1, %c1_i32 : i32
    %10 = arith.extui %9 : i1 to i32
    %c0_i32_8 = arith.constant 0 : i32
    %11 = arith.cmpi ne, %10, %c0_i32_8 : i32
    scf.if %11 {
      %c0_9 = arith.constant 0 : index
      %c0_10 = arith.constant 0 : index
      %12 = vector.load %arg10[%c0_9, %c0_10] : memref<128x128xf32, #tpu.memory_space<vmem>>, vector<128x128xf32>
      %13 = arith.truncf %12 : vector<128x128xf32> to vector<128x128xbf16>
      %c0_11 = arith.constant 0 : index
      %c0_12 = arith.constant 0 : index
      %14 = vector.load %arg2[%c0_11, %c0_12] : memref<128x128xbf16, #tpu.memory_space<vmem>>, vector<128x128xbf16>
      %c0_13 = arith.constant 0 : index
      %c0_14 = arith.constant 0 : index
      %15 = vector.load %arg6[%c0_13, %c0_14] : memref<128x128xbf16, #tpu.memory_space<vmem>>, vector<128x128xbf16>
      %cst_15 = arith.constant dense<0.000000e+00> : vector<128x128xf32>
      %16 = tpu.matmul %14, %15, %cst_15 {dimension_numbers = #tpu.dot_dimension_numbers<[1], [0], [0], [1], [0, 0, 1, 1], [], []>} : vector<128x128xbf16>, vector<128x128xbf16>, vector<128x128xf32> -> vector<128x128xf32>
      %c0_16 = arith.constant 0 : index
      %c0_17 = arith.constant 0 : index
      %17 = vector.load %arg7[%c0_16, %c0_17] : memref<128x128xbf16, #tpu.memory_space<vmem>>, vector<128x128xbf16>
      %cst_18 = arith.constant dense<0.000000e+00> : vector<128x128xf32>
      %18 = tpu.matmul %13, %17, %cst_18 {dimension_numbers = #tpu.dot_dimension_numbers<[1], [0], [0], [1], [0, 0, 1, 1], [], []>} : vector<128x128xbf16>, vector<128x128xbf16>, vector<128x128xf32> -> vector<128x128xf32>
      %19 = arith.addf %16, %18 : vector<128x128xf32>
      %c0_19 = arith.constant 0 : index
      %c0_20 = arith.constant 0 : index
      %20 = vector.load %arg5[%c0_19, %c0_20] : memref<128x128xbf16, #tpu.memory_space<vmem>>, vector<128x128xbf16>
      %c0_21 = arith.constant 0 : index
      %c0_22 = arith.constant 0 : index
      %21 = vector.load %arg8[%c0_21, %c0_22] : memref<128x128xbf16, #tpu.memory_space<vmem>>, vector<128x128xbf16>
      %cst_23 = arith.constant dense<0.000000e+00> : vector<128x128xf32>
      %22 = tpu.matmul %20, %21, %cst_23 {dimension_numbers = #tpu.dot_dimension_numbers<[1], [0], [0], [1], [0, 0, 1, 1], [], []>} : vector<128x128xbf16>, vector<128x128xbf16>, vector<128x128xf32> -> vector<128x128xf32>
      %23 = arith.addf %19, %22 : vector<128x128xf32>
      %cst_24 = arith.constant 0.000000e+00 : f32
      %24 = vector.broadcast %cst_24 : f32 to vector<128x128xf32>
      %25 = arith.maximumf %23, %24 : vector<128x128xf32>
      %26 = arith.truncf %25 : vector<128x128xf32> to vector<128x128xbf16>
      %c0_25 = arith.constant 0 : index
      %c0_26 = arith.constant 0 : index
      %27 = vector.load %arg9[%c0_25, %c0_26] : memref<128x128xbf16, #tpu.memory_space<vmem>>, vector<128x128xbf16>
      tpu.vector_store %arg9[%c0_25, %c0_26], %26 {strides = array<i32>} : memref<128x128xbf16, #tpu.memory_space<vmem>>, vector<128x128xbf16>,
    } else {
    }
    return
  }
  func.func @transform_0(%arg0: i32, %arg1: i32) -> (i32, i32) {
    %c0_i32 = arith.constant 0 : i32
    %c0_i32_0 = arith.constant 0 : i32
    return %arg0, %c0_i32 : i32, i32
  }
  func.func @transform_1(%arg0: i32, %arg1: i32) -> (i32, i32) {
    %c0_i32 = arith.constant 0 : i32
    %c0_i32_0 = arith.constant 0 : i32
    return %arg1, %c0_i32 : i32, i32
  }
  func.func @transform_2(%arg0: i32, %arg1: i32) -> (i32, i32) {
    %c0_i32 = arith.constant 0 : i32
    return %arg0, %arg1 : i32, i32
  }
  func.func @transform_3(%arg0: i32, %arg1: i32) -> (i32, i32) {
    %c0_i32 = arith.constant 0 : i32
    %c0_i32_0 = arith.constant 0 : i32
    return %arg0, %c0_i32 : i32, i32
  }
  func.func @transform_4(%arg0: i32, %arg1: i32) -> (i32, i32) {
    %c0_i32 = arith.constant 0 : i32
    %c0_i32_0 = arith.constant 0 : i32
    %c0_i32_1 = arith.constant 0 : i32
    return %c0_i32, %c0_i32_0 : i32, i32
  }
  func.func @transform_5(%arg0: i32, %arg1: i32) -> (i32, i32) {
    %c0_i32 = arith.constant 0 : i32
    %c0_i32_0 = arith.constant 0 : i32
    %c0_i32_1 = arith.constant 0 : i32
    return %c0_i32, %c0_i32_0 : i32, i32
  }
  func.func @transform_6(%arg0: i32, %arg1: i32) -> (i32, i32) {
    %c0_i32 = arith.constant 0 : i32
    %c0_i32_0 = arith.constant 0 : i32
    %c0_i32_1 = arith.constant 0 : i32
    return %c0_i32, %c0_i32_0 : i32, i32
  }
  func.func @transform_7(%arg0: i32, %arg1: i32) -> (i32, i32) {
    %c0_i32 = arith.constant 0 : i32
    %c0_i32_0 = arith.constant 0 : i32
    return %arg0, %c0_i32 : i32, i32
  }
}

</mosaic_0001>

<bundles_post_ra>
// kernel: sage_forward.2
= control target key start
LH: loop header
LB: loop body
LE: loop exit
PB: predicated region body
PF: predicated region fallthrough
CT: control target
= control target key end

     0   :  { %s2215_s0 = inlined_call_operand.vmem [shape: bf16[256,128], index: 0, kind: input, shape index: {}, may-alias: {0,1}]   ;;  %s2216_s1 = inlined_call_operand.vmem [shape: bf16[256,128], index: 1, kind: input, shape index: {}, may-alias: {0,1}]   ;;  %s2217_s2 = inlined_call_operand.vmem [shape: bf16[256,256], index: 2, kind: input, shape index: {}]   ;;  %s2218_s3 = inlined_call_operand.vmem [shape: bf16[256,128], index: 3, kind: input, shape index: {}]   ;;  %s2219_s4 = inlined_call_operand.vmem [shape: bf16[128,128], index: 4, kind: input, shape index: {}]   ;;  %s2220_s5 = inlined_call_operand.vmem [shape: bf16[128,128], index: 5, kind: input, shape index: {}]   ;;  %s2221_s6 = inlined_call_operand.vmem [shape: bf16[128,128], index: 6, kind: input, shape index: {}]   ;;  %s2222_s7 = inlined_call_operand.vmem [shape: bf16[256,128], index: 7, kind: output, shape index: {}]  }
   0x1   :  { %2223 = sst [smem:[#allocation4_spill]] %s2217_s2 }
   0x2   :  { %s1935_s24 = smov 0   ;;  %s1937_s25 = smov 0  }
   0x3   :  { %s1939_s26 = smov 0   ;;  %s1941_s27 = smov 0  }
   0x4   :  { %s1943_s28 = smov 0   ;;  %s1945_s29 = smov 0  }
   0x5   :  { %s1947_s30 = smov 0  }
   0x6 LB: > { %s26_s8 = sadd.s32 1, %s1884_s28  ;;  %s29_s9 = sadd.s32 1, %s1888_s29  ;;  %s1892_s30 = sphi %s1947_s30, %s17_s30   ;;  %s1888_s29 = sphi %s1945_s29, %s2230_s29   ;;  %s1884_s28 = sphi %s1943_s28, %s2229_s28   ;;  %s1880_s27 = sphi %s1941_s27, %s2228_s27   ;;  %s1876_s26 = sphi %s1939_s26, %s2227_s26   ;;  %s1872_s25 = sphi %s1937_s25, %s2226_s25   ;;  %s1868_s24 = sphi %s1935_s24, %s2225_s24  }
   0x7   : > { %p27_p0 = scmp.ge.s32.totalorder %s26_s8, 2  ;;  %p97_p1 = scmp.ne.s32.totalorder %s1872_s25, %s1868_s24 }
   0x8   : > { %p98_p2 = scmp.eq.s32.totalorder %s1892_s30, 0  ;;  %s90_s13 = sadd.s32 1, %s1872_s25 }
   0x9   : > { %s2232_s8 = smov (%p27_p0, %s26_s8), 0  ;;  %s2234_s9 = smov (!%p27_p0, %s29_s9), %s1888_s29 }
   0xa   : > { %p99_p3 = por %p98_p2, %p97_p1  ;;  %p31_p4 = scmp.ge.s32.totalorder %s2234_s9, 2 }
   0xb   : > { %s86_s10 = ssub.s32 %s1884_s28, %s2232_s8  ;;  %p1386_p6 = scmp.ge.s32.totalorder %s1892_s30, 4 }
   0xc   : > { %s2236_s9 = smov (%p31_p4, %s2234_s9), 0 }
   0xd   : > { %s85_s11 = ssub.s32 %s1888_s29, %s2236_s9  ;;  %247 = sbr.rel (%p1386_p6) target bundleno = 44 (0x2c), region = 28 }
   0xe   : > { %s87_s12 = sor.u32 %s86_s10, %s85_s11 }
   0xf   : > { %p88_p5 = scmp.eq.s32.totalorder %s87_s12, 0 }
  0x11   : > { %s1986_s14 = scalar_select %p88_p5, %s1872_s25, %s90_s13  }
  0x12   : > { %268 = sbr.rel (!%p99_p3) target bundleno = 44 (0x2c), region = 40  ;;  %s270_s15 = sand.u32 (%p99_p3), 1, %s1872_s25  }
  0x13   : > { %s1629_s16 = sshll.u32 (%p99_p3), %s1888_s29, 5  ;;  %s1387_s17 = sshll.u32 (%p99_p3), %s270_s15, 6 }
  0x14   : > { %s275_s18 = sadd.s32 (%p99_p3), %s1884_s28, %s1629_s16  ;;  %s2224_s2 = sld [smem:[#allocation4_spill]] (%p99_p3) }
  0x15   : > { %s1390_s19 = sshll.u32 (%p99_p3), %s275_s18, 2  ;;  %s272_s23 = scalar_lea.vmem (%p99_p3), [#allocation3], %s1387_s17 }
  0x1a   : > { %s1995_s22 = scalar_lea.vmem %s2224_s2, %s1390_s19 }
  0x1b   : > { %v294_v0 = vld [vmem:[%s1995_s22] sm:$0xf]  ;;  %v296_v1 = vld [vmem:[%s1995_s22 + $0x8] sm:$0xf]  ;;  %v298_v2 = vld [vmem:[%s1995_s22 + $0x10] sm:$0xf] }
  0x1c   : > { %295 = vst [vmem:[%s272_s23] sm:$0xf] %v294_v0  ;;  %v300_v3 = vld [vmem:[%s1995_s22 + $0x18] sm:$0xf]  ;;  %v302_v4 = vld [vmem:[%s1995_s22 + $0x20] sm:$0xf] }
  0x1d   : > { %297 = vst [vmem:[%s272_s23 + $0x4] sm:$0xf] %v296_v1  ;;  %v304_v5 = vld [vmem:[%s1995_s22 + $0x28] sm:$0xf]  ;;  %v306_v6 = vld [vmem:[%s1995_s22 + $0x30] sm:$0xf] }
  0x1e   : > { %299 = vst [vmem:[%s272_s23 + $0x8] sm:$0xf] %v298_v2  ;;  %v308_v7 = vld [vmem:[%s1995_s22 + $0x38] sm:$0xf]  ;;  %v310_v8 = vld [vmem:[%s1995_s22 + $0x40] sm:$0xf] }
  0x1f   : > { %301 = vst [vmem:[%s272_s23 + $0xc] sm:$0xf] %v300_v3  ;;  %v312_v9 = vld [vmem:[%s1995_s22 + $0x48] sm:$0xf]  ;;  %v314_v10 = vld [vmem:[%s1995_s22 + $0x50] sm:$0xf] }
  0x20   : > { %303 = vst [vmem:[%s272_s23 + $0x10] sm:$0xf] %v302_v4  ;;  %v316_v11 = vld [vmem:[%s1995_s22 + $0x58] sm:$0xf]  ;;  %v318_v12 = vld [vmem:[%s1995_s22 + $0x60] sm:$0xf] }
  0x21   : > { %305 = vst [vmem:[%s272_s23 + $0x14] sm:$0xf] %v304_v5  ;;  %v320_v13 = vld [vmem:[%s1995_s22 + $0x68] sm:$0xf]  ;;  %v322_v14 = vld [vmem:[%s1995_s22 + $0x70] sm:$0xf] }
  0x22   : > { %307 = vst [vmem:[%s272_s23 + $0x18] sm:$0xf] %v306_v6  ;;  %v324_v15 = vld [vmem:[%s1995_s22 + $0x78] sm:$0xf] }
  0x23   : > { %309 = vst [vmem:[%s272_s23 + $0x1c] sm:$0xf] %v308_v7 }
  0x24   : > { %311 = vst [vmem:[%s272_s23 + $0x20] sm:$0xf] %v310_v8 }
  0x25   : > { %313 = vst [vmem:[%s272_s23 + $0x24] sm:$0xf] %v312_v9 }
  0x26   : > { %315 = vst [vmem:[%s272_s23 + $0x28] sm:$0xf] %v314_v10 }
  0x27   : > { %317 = vst [vmem:[%s272_s23 + $0x2c] sm:$0xf] %v316_v11 }
  0x28   : > { %319 = vst [vmem:[%s272_s23 + $0x30] sm:$0xf] %v318_v12 }
  0x29   : > { %321 = vst [vmem:[%s272_s23 + $0x34] sm:$0xf] %v320_v13 }
  0x2a   : > { %323 = vst [vmem:[%s272_s23 + $0x38] sm:$0xf] %v322_v14 }
  0x2b   : > { %325 = vst [vmem:[%s272_s23 + $0x3c] sm:$0xf] %v324_v15 }
  0x2c PF: > { %p1391_p7 = scmp.ge.s32.totalorder %s1892_s30, 1  ;;  %p389_p8 = scmp.lt.s32.totalorder %s1892_s30, 5 }
  0x2e   : > { %p390_p9 = pnand %p1391_p7, %p389_p8 }
  0x2f   : > { %s396_s10 = sand.u32 (!%p390_p9), 1, %s1868_s24   ;;  %s1393_s11 = sshll.u32 (!%p390_p9), %s1880_s27, 4 }
  0x30   : > { %393 = sbr.rel (%p390_p9) target bundleno = 533 (0x215), region = 85  ;;  %s1392_s12 = sshll.u32 (!%p390_p9), %s396_s10, 6 }
  0x31   : > { %p443_p10 = scmp.lt.s32.totalorder (!%p390_p9), %s1393_s11, 31  ;;  %s1395_s13 = sshll.u32 (!%p390_p9), %s1876_s26, 4 }
  0x32   : > { %p449_p11 = scmp.lt.s32.totalorder (!%p390_p9), %s1395_s13, 31  ;;  %s2038_s16 = scalar_lea.vmem (!%p390_p9), [#allocation3], %s1392_s12 }
  0x33   : > { %p1401_p12 = scmp.ne.s32.totalorder (!%p390_p9), %s1876_s26, 0 }
  0x35   : > { %s2238_s11 = smov (!%p443_p10, %s1393_s11), 31  ;;  %s2240_s13 = smov (!%p449_p11, %s1395_s13), 31 }
  0x36   : > { %s1394_s15 = sshll.u32 %s2238_s11, 2  ;;  %s1396_s23 = sshll.u32 %s2240_s13, 2 }
  0x37   : > { %s2021_s18 = scalar_lea.vmem %s2215_s0, %s1394_s15  ;;  %s2026_s21 = scalar_lea.vmem %s2218_s3, %s1394_s15 }
  0x38   : > { %s2031_s27 = scalar_lea.vmem %s2222_s7, %s1394_s15  ;;  %s2036_s11 = scalar_lea.vmem %s2216_s1, %s1396_s23 }
  0x39   : > { %470 = sbr.rel (%p1401_p12) target bundleno = 79 (0x4f), region = 93 }
  0x3e   : > { %v1894_v16 = vmov 0.0  }
  0x3f   : > { %471 = vst [vmem:[#allocation2 + $0x30] sm:$0xff] %v1894_v16 }
  0x40   : > { %472 = vst [vmem:[#allocation2] sm:$0xff] %v1894_v16 }
  0x41   : > { %473 = vst [vmem:[#allocation2 + $0x58] sm:$0xff] %v1894_v16 }
  0x42   : > { %474 = vst [vmem:[#allocation2 + $0x18] sm:$0xff] %v1894_v16 }
  0x43   : > { %475 = vst [vmem:[#allocation2 + $0x50] sm:$0xff] %v1894_v16 }
  0x44   : > { %476 = vst [vmem:[#allocation2 + $0x68] sm:$0xff] %v1894_v16 }
  0x45   : > { %477 = vst [vmem:[#allocation2 + $0x8] sm:$0xff] %v1894_v16 }
  0x46   : > { %478 = vst [vmem:[#allocation2 + $0x48] sm:$0xff] %v1894_v16 }
  0x47   : > { %479 = vst [vmem:[#allocation2 + $0x40] sm:$0xff] %v1894_v16 }
  0x48   : > { %480 = vst [vmem:[#allocation2 + $0x20] sm:$0xff] %v1894_v16 }
  0x49   : > { %481 = vst [vmem:[#allocation2 + $0x10] sm:$0xff] %v1894_v16 }
  0x4a   : > { %482 = vst [vmem:[#allocation2 + $0x38] sm:$0xff] %v1894_v16 }
  0x4b   : > { %483 = vst [vmem:[#allocation2 + $0x60] sm:$0xff] %v1894_v16 }
  0x4c   : > { %484 = vst [vmem:[#allocation2 + $0x70] sm:$0xff] %v1894_v16 }
  0x4d   : > { %485 = vst [vmem:[#allocation2 + $0x78] sm:$0xff] %v1894_v16 }
  0x4e   : > { %486 = vst [vmem:[#allocation2 + $0x28] sm:$0xff] %v1894_v16 }
  0x4f PF: > { %v1645_v17 = vld [vmem:[%s2036_s11 + $0x38] sm:$0xff]  ;;  %v1644_v18 = vld [vmem:[%s2036_s11 + $0x30] sm:$0xff]  ;;  %v1643_v19 = vld [vmem:[%s2036_s11 + $0x28] sm:$0xff]  ;;  %p1466_p13 = scmp.ne.s32.totalorder %s1876_s26, 1 }
  0x50   : > { %631 = vmatpush.bf16.msra.mxu0 %v1645_v17  ;;  %1733 = vmatpush.bf16.msra.mxu1 %v1645_v17  ;;  %v1642_v20 = vld [vmem:[%s2036_s11 + $0x20] sm:$0xff]  ;;  %v1641_v21 = vld [vmem:[%s2036_s11 + $0x18] sm:$0xff]  ;;  %v1640_v22 = vld [vmem:[%s2036_s11 + $0x10] sm:$0xff] }
  0x51   : > { %1734 = vmatpush.bf16.msra.mxu2 %v1645_v17  ;;  %1735 = vmatpush.bf16.msra.mxu3 %v1645_v17  ;;  %v1639_v23 = vld [vmem:[%s2036_s11 + $0x8] sm:$0xff]  ;;  %v1638_v24 = vld [vmem:[%s2036_s11] sm:$0xff]  ;;  %v1632_v26 = vld [vmem:[%s2038_s16 + $0x10] sm:$0xff] }
  0x52   : > { %v1630_v25 = vld [vmem:[%s2038_s16] sm:$0xff]  ;;  %v1636_v28 = vld [vmem:[%s2038_s16 + $0x30] sm:$0xff]  ;;  %v1631_v29 = vld [vmem:[%s2038_s16 + $0x8] sm:$0xff] }
  0x53   : > { %v1634_v27 = vld [vmem:[%s2038_s16 + $0x20] sm:$0xff]  ;;  %v1633_v30 = vld [vmem:[%s2038_s16 + $0x18] sm:$0xff]  ;;  %v1635_v31 = vld [vmem:[%s2038_s16 + $0x28] sm:$0xff] }
  0x54   : > { %632 = vmatpush.bf16.msra.mxu0 %v1644_v18  ;;  %1736 = vmatpush.bf16.msra.mxu1 %v1644_v18  ;;  %v1637_v32 = vld [vmem:[%s2038_s16 + $0x38] sm:$0xff]  ;;  %v487_v33 = vld [vmem:[#allocation2 + $0x30] sm:$0xff]  ;;  %v495_v39 = vld [vmem:[#allocation2 + $0x40] sm:$0xff] }
  0x55   : > { %1737 = vmatpush.bf16.msra.mxu2 %v1644_v18  ;;  %1738 = vmatpush.bf16.msra.mxu3 %v1644_v18  ;;  %v491_v34 = vld [vmem:[#allocation2 + $0x50] sm:$0xff]  ;;  %v499_v40 = vld [vmem:[#allocation2 + $0x60] sm:$0xff]  ;;  %v492_v42 = vld [vmem:[#allocation2 + $0x68] sm:$0xff] }
  0x56   : > { %v488_v41 = vld [vmem:[#allocation2] sm:$0xff]  ;;  %v500_v52 = vld [vmem:[#allocation2 + $0x70] sm:$0xff]  ;;  %v489_v53 = vld [vmem:[#allocation2 + $0x58] sm:$0xff] }
  0x57   : > { %v496_v51 = vld [vmem:[#allocation2 + $0x20] sm:$0xff]  ;;  %v493_v54 = vld [vmem:[#allocation2 + $0x8] sm:$0xff]  ;;  %v497_v63 = vld [vmem:[#allocation2 + $0x10] sm:$0xff] }
  0x58   : > { %633 = vmatpush.bf16.msra.mxu0 %v1643_v19  ;;  %1739 = vmatpush.bf16.msra.mxu1 %v1643_v19  ;;  %v501_v0 = vld [vmem:[#allocation2 + $0x78] sm:$0xff]  ;;  %v494_v2 = vld [vmem:[#allocation2 + $0x48] sm:$0xff] }
  0x59   : > { %1740 = vmatpush.bf16.msra.mxu2 %v1643_v19  ;;  %1741 = vmatpush.bf16.msra.mxu3 %v1643_v19  ;;  %v490_v1 = vld [vmem:[#allocation2 + $0x18] sm:$0xff]  ;;  %v502_v12 = vld [vmem:[#allocation2 + $0x28] sm:$0xff] }
  0x5a   : > { %v498_v11 = vld [vmem:[#allocation2 + $0x38] sm:$0xff] }
  0x5c   : > { %634 = vmatpush.bf16.msra.mxu0 %v1642_v20  ;;  %1742 = vmatpush.bf16.msra.mxu1 %v1642_v20 }
  0x5d   : > { %1743 = vmatpush.bf16.msra.mxu2 %v1642_v20  ;;  %1744 = vmatpush.bf16.msra.mxu3 %v1642_v20 }
  0x60   : > { %635 = vmatpush.bf16.msra.mxu0 %v1641_v21  ;;  %1745 = vmatpush.bf16.msra.mxu1 %v1641_v21 }
  0x61   : > { %1746 = vmatpush.bf16.msra.mxu2 %v1641_v21  ;;  %1747 = vmatpush.bf16.msra.mxu3 %v1641_v21 }
  0x64   : > { %636 = vmatpush.bf16.msra.mxu0 %v1640_v22  ;;  %1748 = vmatpush.bf16.msra.mxu1 %v1640_v22 }
  0x65   : > { %1749 = vmatpush.bf16.msra.mxu2 %v1640_v22  ;;  %1750 = vmatpush.bf16.msra.mxu3 %v1640_v22 }
  0x68   : > { %637 = vmatpush.bf16.msra.mxu0 %v1639_v23  ;;  %1751 = vmatpush.bf16.msra.mxu1 %v1639_v23 }
  0x69   : > { %1752 = vmatpush.bf16.msra.mxu2 %v1639_v23  ;;  %1753 = vmatpush.bf16.msra.mxu3 %v1639_v23 }
  0x6c   : > { %638 = vmatpush.bf16.msra.mxu0 %v1638_v24  ;;  %1754 = vmatpush.bf16.msra.mxu1 %v1638_v24 }
  0x6d   : > { %1755 = vmatpush.bf16.msra.mxu2 %v1638_v24  ;;  %1756 = vmatpush.bf16.msra.mxu3 %v1638_v24 }
  0x6f   : > { %639 = vmatmul.bf16.vlgmr.msra.gmra.mxu0 %v1630_v25  ;;  %649 = vmatmul.bf16.vlgmr.msra.gmra.mxu1 %v1632_v26 }
  0x70   : > { %659 = vmatmul.bf16.vlgmr.msra.gmra.mxu2 %v1634_v27  ;;  %669 = vmatmul.bf16.vlgmr.msra.gmra.mxu3 %v1636_v28 }
  0x7f   : > { %644 = vmatmul.bf16.gmra.mxu0 %v1631_v29  ;;  %654 = vmatmul.bf16.gmra.mxu1 %v1633_v30 }
  0x80   : > { %664 = vmatmul.bf16.gmra.mxu2 %v1635_v31  ;;  %674 = vmatmul.bf16.gmra.mxu3 %v1637_v32 }
  0xec   : > { %v640_v35 = vpop.f32.mrf.mxu0  ;;  %v650_v36 = vpop.f32.mrf.mxu1 }
  0xed   : > { %v680_v37 = vadd.f32 %v640_v35, %v487_v33  ;;  %v684_v38 = vadd.f32 %v650_v36, %v491_v34 }
  0xef   : > { %696 = vst [vmem:[#allocation2 + $0x30] sm:$0xff] %v680_v37 }
  0xf0   : > { %700 = vst [vmem:[#allocation2 + $0x50] sm:$0xff] %v684_v38 }
  0xf3   : > { %v660_v43 = vpop.f32.mrf.mxu2  ;;  %v670_v44 = vpop.f32.mrf.mxu3 }
  0xf4   : > { %v688_v45 = vadd.f32 %v660_v43, %v495_v39  ;;  %v692_v46 = vadd.f32 %v670_v44, %v499_v40  ;;  %v642_v47 = vpop.f32.mrf.mxu0  ;;  %v652_v48 = vpop.f32.mrf.mxu1 }
  0xf5   : > { %v681_v49 = vadd.f32 %v642_v47, %v488_v41  ;;  %v685_v50 = vadd.f32 %v652_v48, %v492_v42 }
  0xf6   : > { %704 = vst [vmem:[#allocation2 + $0x40] sm:$0xff] %v688_v45 }
  0xf7   : > { %708 = vst [vmem:[#allocation2 + $0x60] sm:$0xff] %v692_v46 }
  0xf8   : > { %697 = vst [vmem:[#allocation2] sm:$0xff] %v681_v49 }
  0xf9   : > { %701 = vst [vmem:[#allocation2 + $0x68] sm:$0xff] %v685_v50 }
  0xfb   : > { %v662_v55 = vpop.f32.mrf.mxu2  ;;  %v672_v56 = vpop.f32.mrf.mxu3 }
  0xfc   : > { %v689_v57 = vadd.f32 %v662_v55, %v496_v51  ;;  %v693_v58 = vadd.f32 %v672_v56, %v500_v52  ;;  %v645_v59 = vpop.f32.mrf.mxu0  ;;  %v655_v60 = vpop.f32.mrf.mxu1 }
  0xfd   : > { %v682_v61 = vadd.f32 %v645_v59, %v489_v53  ;;  %v686_v62 = vadd.f32 %v655_v60, %v493_v54 }
  0xfe   : > { %705 = vst [vmem:[#allocation2 + $0x20] sm:$0xff] %v689_v57 }
  0xff   : > { %709 = vst [vmem:[#allocation2 + $0x70] sm:$0xff] %v693_v58 }
 0x100   : > { %698 = vst [vmem:[#allocation2 + $0x58] sm:$0xff] %v682_v61 }
 0x101   : > { %702 = vst [vmem:[#allocation2 + $0x8] sm:$0xff] %v686_v62 }
 0x103   : > { %v665_v3 = vpop.f32.mrf.mxu2  ;;  %v675_v4 = vpop.f32.mrf.mxu3 }
 0x104   : > { %v690_v5 = vadd.f32 %v665_v3, %v497_v63  ;;  %v694_v6 = vadd.f32 %v675_v4, %v501_v0  ;;  %v647_v7 = vpop.f32.mrf.mxu0  ;;  %v657_v8 = vpop.f32.mrf.mxu1 }
 0x105   : > { %v683_v9 = vadd.f32 %v647_v7, %v490_v1  ;;  %v687_v10 = vadd.f32 %v657_v8, %v494_v2 }
 0x106   : > { %706 = vst [vmem:[#allocation2 + $0x10] sm:$0xff] %v690_v5 }
 0x107   : > { %710 = vst [vmem:[#allocation2 + $0x78] sm:$0xff] %v694_v6 }
 0x108   : > { %699 = vst [vmem:[#allocation2 + $0x18] sm:$0xff] %v683_v9 }
 0x109   : > { %703 = vst [vmem:[#allocation2 + $0x48] sm:$0xff] %v687_v10 }
 0x10b   : > { %v667_v13 = vpop.f32.mrf.mxu2  ;;  %v677_v14 = vpop.f32.mrf.mxu3  ;;  %715 = sbr.rel (%p1466_p13) target bundleno = 533 (0x215), region = 97 }
 0x10c   : > { %v691_v15 = vadd.f32 %v667_v13, %v498_v11  ;;  %v695_v16 = vadd.f32 %v677_v14, %v502_v12 }
 0x10e   : > { %707 = vst [vmem:[#allocation2 + $0x38] sm:$0xff] %v691_v15 }
 0x10f   : > { %711 = vst [vmem:[#allocation2 + $0x28] sm:$0xff] %v695_v16 }
 0x110   : > { %v1669_v17 = vld [vmem:[%s2220_s5 + $0x38] sm:$0xff]  ;;  %v1668_v20 = vld [vmem:[%s2220_s5 + $0x30] sm:$0xff]  ;;  %v1667_v23 = vld [vmem:[%s2220_s5 + $0x28] sm:$0xff] }
 0x111   : > { %v1661_v18 = vld [vmem:[%s2219_s4 + $0x38] sm:$0xff]  ;;  %836 = vmatpush.bf16.msra.mxu0 %v1669_v17  ;;  %1757 = vmatpush.bf16.msra.mxu3 %v1669_v17  ;;  %v1660_v21 = vld [vmem:[%s2219_s4 + $0x30] sm:$0xff]  ;;  %v1659_v24 = vld [vmem:[%s2219_s4 + $0x28] sm:$0xff] }
 0x112   : > { %v2067_v19 = vld [vmem:[%s2221_s6 + $0x38] sm:$0xff]  ;;  %981 = vmatpush.bf16.msra.mxu1 %v1661_v18  ;;  %v2079_v22 = vld [vmem:[%s2221_s6 + $0x30] sm:$0xff]  ;;  %v2091_v25 = vld [vmem:[%s2221_s6 + $0x28] sm:$0xff] }
 0x113   : > { %1158 = vmatpush.bf16.msra.mxu2 %v2067_v19  ;;  %v1666_v26 = vld [vmem:[%s2220_s5 + $0x20] sm:$0xff]  ;;  %v1665_v29 = vld [vmem:[%s2220_s5 + $0x18] sm:$0xff]  ;;  %v1664_v32 = vld [vmem:[%s2220_s5 + $0x10] sm:$0xff] }
 0x114   : > { %v1658_v27 = vld [vmem:[%s2219_s4 + $0x20] sm:$0xff]  ;;  %v1657_v30 = vld [vmem:[%s2219_s4 + $0x18] sm:$0xff]  ;;  %v1656_v33 = vld [vmem:[%s2219_s4 + $0x10] sm:$0xff] }
 0x115   : > { %837 = vmatpush.bf16.msra.mxu0 %v1668_v20  ;;  %1758 = vmatpush.bf16.msra.mxu3 %v1668_v20  ;;  %v2103_v28 = vld [vmem:[%s2221_s6 + $0x20] sm:$0xff]  ;;  %v2115_v31 = vld [vmem:[%s2221_s6 + $0x18] sm:$0xff]  ;;  %v2127_v34 = vld [vmem:[%s2221_s6 + $0x10] sm:$0xff] }
 0x116   : > { %982 = vmatpush.bf16.msra.mxu1 %v1660_v21  ;;  %v1663_v35 = vld [vmem:[%s2220_s5 + $0x8] sm:$0xff]  ;;  %v1662_v38 = vld [vmem:[%s2220_s5] sm:$0xff]  ;;  %v716_v39 = vld [vmem:[#allocation2 + $0x30] sm:$0xff] }
 0x117   : > { %1159 = vmatpush.bf16.msra.mxu2 %v2079_v22  ;;  %v1655_v36 = vld [vmem:[%s2219_s4 + $0x8] sm:$0xff]  ;;  %v717_v40 = vld [vmem:[#allocation2] sm:$0xff]  ;;  %v729_v42 = vld [vmem:[#allocation2 + $0x70] sm:$0xff] }
 0x118   : > { %v2139_v37 = vld [vmem:[%s2221_s6 + $0x8] sm:$0xff]  ;;  %v728_v41 = vld [vmem:[#allocation2 + $0x60] sm:$0xff]  ;;  %v732_v45 = vpack.c.bf16 %v717_v40, %v716_v39  ;;  %v718_v49 = vld [vmem:[#allocation2 + $0x58] sm:$0xff] }
 0x119   : > { %838 = vmatpush.bf16.msra.mxu0 %v1667_v23  ;;  %1759 = vmatpush.bf16.msra.mxu3 %v1667_v23  ;;  %v1654_v43 = vld [vmem:[%s2219_s4] sm:$0xff]  ;;  %v738_v46 = vpack.c.bf16 %v729_v42, %v728_v41  ;;  %v719_v50 = vld [vmem:[#allocation2 + $0x18] sm:$0xff]  ;;  %v731_v52 = vld [vmem:[#allocation2 + $0x28] sm:$0xff] }
 0x11a   : > { %983 = vmatpush.bf16.msra.mxu1 %v1659_v24  ;;  %v1678_v44 = vld [vmem:[%s2221_s6] sm:$0xff]  ;;  %v730_v51 = vld [vmem:[#allocation2 + $0x78] sm:$0xff]  ;;  %v733_v53 = vpack.c.bf16 %v719_v50, %v718_v49  ;;  %v1647_v55 = vld [vmem:[%s2021_s18 + $0x8] sm:$0xff] }
 0x11b   : > { %1160 = vmatpush.bf16.msra.mxu2 %v2091_v25  ;;  %v1646_v47 = vld [vmem:[%s2021_s18] sm:$0xff]  ;;  %v739_v54 = vpack.c.bf16 %v731_v52, %v730_v51  ;;  %v1671_v56 = vld [vmem:[%s2026_s21 + $0x8] sm:$0xff]  ;;  %v720_v57 = vld [vmem:[#allocation2 + $0x50] sm:$0xff] }
 0x11c   : > { %v1670_v48 = vld [vmem:[%s2026_s21] sm:$0xff]  ;;  %v721_v58 = vld [vmem:[#allocation2 + $0x68] sm:$0xff]  ;;  %v1652_v60 = vld [vmem:[%s2021_s18 + $0x30] sm:$0xff] }
 0x11d   : > { %839 = vmatpush.bf16.msra.mxu0 %v1666_v26  ;;  %1760 = vmatpush.bf16.msra.mxu3 %v1666_v26  ;;  %v734_v59 = vpack.c.bf16 %v721_v58, %v720_v57  ;;  %v1648_v61 = vld [vmem:[%s2021_s18 + $0x10] sm:$0xff]  ;;  %v722_v63 = vld [vmem:[#allocation2 + $0x8] sm:$0xff]  ;;  %v1653_v2 = vld [vmem:[%s2021_s18 + $0x38] sm:$0xff] }
 0x11e   : > { %984 = vmatpush.bf16.msra.mxu1 %v1658_v27  ;;  %v1672_v62 = vld [vmem:[%s2026_s21 + $0x10] sm:$0xff]  ;;  %v723_v0 = vld [vmem:[#allocation2 + $0x48] sm:$0xff]  ;;  %v1649_v3 = vld [vmem:[%s2021_s18 + $0x18] sm:$0xff] }
 0x11f   : > { %1161 = vmatpush.bf16.msra.mxu2 %v2103_v28  ;;  %v735_v1 = vpack.c.bf16 %v723_v0, %v722_v63  ;;  %v1673_v4 = vld [vmem:[%s2026_s21 + $0x18] sm:$0xff]  ;;  %v724_v5 = vld [vmem:[#allocation2 + $0x40] sm:$0xff]  ;;  %v1676_v8 = vld [vmem:[%s2026_s21 + $0x30] sm:$0xff] }
 0x120   : > { %v725_v6 = vld [vmem:[#allocation2 + $0x20] sm:$0xff]  ;;  %v726_v11 = vld [vmem:[#allocation2 + $0x10] sm:$0xff]  ;;  %v727_v12 = vld [vmem:[#allocation2 + $0x38] sm:$0xff] }
 0x121   : > { %840 = vmatpush.bf16.msra.mxu0 %v1665_v29  ;;  %1761 = vmatpush.bf16.msra.mxu3 %v1665_v29  ;;  %v736_v7 = vpack.c.bf16 %v725_v6, %v724_v5  ;;  %v1650_v9 = vld [vmem:[%s2021_s18 + $0x20] sm:$0xff]  ;;  %v737_v13 = vpack.c.bf16 %v727_v12, %v726_v11  ;;  %v1677_v14 = vld [vmem:[%s2026_s21 + $0x38] sm:$0xff]  ;;  %v1651_v15 = vld [vmem:[%s2021_s18 + $0x28] sm:$0xff] }
 0x122   : > { %985 = vmatpush.bf16.msra.mxu1 %v1657_v30  ;;  %v1674_v10 = vld [vmem:[%s2026_s21 + $0x20] sm:$0xff]  ;;  %v1675_v16 = vld [vmem:[%s2026_s21 + $0x28] sm:$0xff] }
 0x123   : > { %1162 = vmatpush.bf16.msra.mxu2 %v2115_v31 }
 0x125   : > { %841 = vmatpush.bf16.msra.mxu0 %v1664_v32  ;;  %1762 = vmatpush.bf16.msra.mxu3 %v1664_v32 }
 0x126   : > { %986 = vmatpush.bf16.msra.mxu1 %v1656_v33 }
 0x127   : > { %1163 = vmatpush.bf16.msra.mxu2 %v2127_v34 }
 0x129   : > { %842 = vmatpush.bf16.msra.mxu0 %v1663_v35  ;;  %1763 = vmatpush.bf16.msra.mxu3 %v1663_v35 }
 0x12a   : > { %987 = vmatpush.bf16.msra.mxu1 %v1655_v36 }
 0x12b   : > { %1164 = vmatpush.bf16.msra.mxu2 %v2139_v37 }
 0x12d   : > { %843 = vmatpush.bf16.msra.mxu0 %v1662_v38  ;;  %1764 = vmatpush.bf16.msra.mxu3 %v1662_v38 }
 0x12e   : > { %988 = vmatpush.bf16.msra.mxu1 %v1654_v43 }
 0x12f   : > { %1165 = vmatpush.bf16.msra.mxu2 %v1678_v44 }
 0x130   : > { %844 = vmatmul.bf16.vlgmr.msra.gmra.mxu0 %v732_v45  ;;  %874 = vmatmul.bf16.vlgmr.msra.gmra.mxu3 %v738_v46 }
 0x131   : > { %1765 = vmatpush.bf16.msrb.mxu3 %v1661_v18  ;;  %989 = vmatmul.bf16.vlgmr.msra.gmra.mxu1 %v1646_v47 }
 0x132   : > { %1166 = vmatmul.bf16.vlgmr.msra.gmra.mxu2 %v1670_v48 }
 0x135   : > { %1766 = vmatpush.bf16.msrb.mxu3 %v1660_v21 }
 0x139   : > { %1767 = vmatpush.bf16.msrb.mxu3 %v1659_v24 }
 0x13d   : > { %1768 = vmatpush.bf16.msrb.mxu3 %v1658_v27 }
 0x140   : > { %849 = vmatmul.bf16.gmra.mxu0 %v733_v53  ;;  %879 = vmatmul.bf16.gmra.mxu3 %v739_v54 }
 0x141   : > { %1769 = vmatpush.bf16.msrb.mxu3 %v1657_v30  ;;  %994 = vmatmul.bf16.gmra.mxu1 %v1647_v55 }
 0x142   : > { %1171 = vmatmul.bf16.gmra.mxu2 %v1671_v56 }
 0x145   : > { %1770 = vmatpush.bf16.msrb.mxu3 %v1656_v33 }
 0x149   : > { %1771 = vmatpush.bf16.msrb.mxu3 %v1655_v36 }
 0x14d   : > { %1772 = vmatpush.bf16.msrb.mxu3 %v1654_v43 }
 0x150   : > { %854 = vmatmul.bf16.gmra.mxu0 %v734_v59  ;;  %1019 = vmatmul.bf16.vlgmr.msrb.gmra.mxu3 %v1652_v60 }
 0x151   : > { %1773 = vmatpush.bf16.msra.mxu3 %v2067_v19  ;;  %999 = vmatmul.bf16.gmra.mxu1 %v1648_v61 }
 0x152   : > { %1176 = vmatmul.bf16.gmra.mxu2 %v1672_v62 }
 0x155   : > { %1774 = vmatpush.bf16.msra.mxu3 %v2079_v22 }
 0x159   : > { %1775 = vmatpush.bf16.msra.mxu3 %v2091_v25 }
 0x15d   : > { %1776 = vmatpush.bf16.msra.mxu3 %v2103_v28 }
 0x160   : > { %859 = vmatmul.bf16.gmra.mxu0 %v735_v1  ;;  %1024 = vmatmul.bf16.gmra.mxu3 %v1653_v2 }
 0x161   : > { %1777 = vmatpush.bf16.msra.mxu3 %v2115_v31  ;;  %1004 = vmatmul.bf16.gmra.mxu1 %v1649_v3 }
 0x162   : > { %1181 = vmatmul.bf16.gmra.mxu2 %v1673_v4 }
 0x165   : > { %1778 = vmatpush.bf16.msra.mxu3 %v2127_v34 }
 0x169   : > { %1779 = vmatpush.bf16.msra.mxu3 %v2139_v37 }
 0x16d   : > { %1780 = vmatpush.bf16.msra.mxu3 %v1678_v44 }
 0x170   : > { %864 = vmatmul.bf16.gmra.mxu0 %v736_v7  ;;  %1196 = vmatmul.bf16.vlgmr.msra.gmra.mxu3 %v1676_v8 }
 0x171   : > { %1009 = vmatmul.bf16.gmra.mxu1 %v1650_v9 }
 0x172   : > { %1186 = vmatmul.bf16.gmra.mxu2 %v1674_v10 }
 0x180   : > { %869 = vmatmul.bf16.gmra.mxu0 %v737_v13  ;;  %1201 = vmatmul.bf16.gmra.mxu3 %v1677_v14 }
 0x181   : > { %1014 = vmatmul.bf16.gmra.mxu1 %v1651_v15 }
 0x182   : > { %1191 = vmatmul.bf16.gmra.mxu2 %v1675_v16 }
 0x1ad   : > { %v845_v17 = vpop.f32.mrf.mxu0 }
 0x1ae   : > { %v990_v18 = vpop.f32.mrf.mxu1 }
 0x1af   : > { %v991_v23 = vadd.f32 %v990_v18, %v845_v17 }
 0x1b3   : > { %v2174_v19 = vpop.f32.mrf.mxu3 }
 0x1b5   : > { %v1167_v20 = vpop.f32.mrf.mxu2  ;;  %v847_v21 = vpop.f32.mrf.mxu0 }
 0x1b6   : > { %v992_v22 = vpop.f32.mrf.mxu1  ;;  %v1207_v24 = vadd.f32 %v1167_v20, %v991_v23 }
 0x1b7   : > { %v993_v25 = vadd.f32 %v992_v22, %v847_v21 }
 0x1b8   : > { %v1223_v31 = vmax.f32 %v1207_v24, 0.0 }
 0x1bb   : > { %v2176_v26 = vpop.f32.mrf.mxu3 }
 0x1bd   : > { %v1169_v27 = vpop.f32.mrf.mxu2  ;;  %v850_v29 = vpop.f32.mrf.mxu0 }
 0x1be   : > { %v1208_v28 = vadd.f32 %v1169_v27, %v993_v25  ;;  %v995_v30 = vpop.f32.mrf.mxu1 }
 0x1bf   : > { %v996_v38 = vadd.f32 %v995_v30, %v850_v29 }
 0x1c0   : > { %v1224_v32 = vmax.f32 %v1208_v28, 0.0 }
 0x1c2   : > { %v1689_v33 = vpack.c.bf16 %v1224_v32, %v1223_v31 }
 0x1c3   : > { %v2179_v34 = vpop.f32.mrf.mxu3 }
 0x1c4   : > { %1690 = vst [vmem:[%s2031_s27] sm:$0xff] %v1689_v33  }
 0x1c5   : > { %v1172_v35 = vpop.f32.mrf.mxu2  ;;  %v852_v36 = vpop.f32.mrf.mxu0 }
 0x1c6   : > { %v997_v37 = vpop.f32.mrf.mxu1  ;;  %v1209_v39 = vadd.f32 %v1172_v35, %v996_v38 }
 0x1c7   : > { %v998_v40 = vadd.f32 %v997_v37, %v852_v36 }
 0x1c8   : > { %v1225_v46 = vmax.f32 %v1209_v39, 0.0 }
 0x1cb   : > { %v2181_v41 = vpop.f32.mrf.mxu3 }
 0x1cd   : > { %v1174_v42 = vpop.f32.mrf.mxu2  ;;  %v855_v44 = vpop.f32.mrf.mxu0 }
 0x1ce   : > { %v1210_v43 = vadd.f32 %v1174_v42, %v998_v40  ;;  %v1000_v45 = vpop.f32.mrf.mxu1 }
 0x1cf   : > { %v1001_v53 = vadd.f32 %v1000_v45, %v855_v44 }
 0x1d0   : > { %v1226_v47 = vmax.f32 %v1210_v43, 0.0 }
 0x1d2   : > { %v1694_v48 = vpack.c.bf16 %v1226_v47, %v1225_v46 }
 0x1d3   : > { %v1020_v49 = vpop.f32.mrf.mxu3 }
 0x1d4   : > { %1726 = vst [vmem:[%s2031_s27 + $0x8] sm:$0xff] %v1694_v48   ;;  %v1021_v21 = vadd.f32 %v1020_v49, %v2174_v19 }
 0x1d5   : > { %v1177_v50 = vpop.f32.mrf.mxu2  ;;  %v857_v51 = vpop.f32.mrf.mxu0 }
 0x1d6   : > { %v1002_v52 = vpop.f32.mrf.mxu1  ;;  %v1211_v54 = vadd.f32 %v1177_v50, %v1001_v53 }
 0x1d7   : > { %v1003_v55 = vadd.f32 %v1002_v52, %v857_v51 }
 0x1d8   : > { %v1227_v61 = vmax.f32 %v1211_v54, 0.0 }
 0x1db   : > { %v1022_v56 = vpop.f32.mrf.mxu3 }
 0x1dc   : > { %v1023_v22 = vadd.f32 %v1022_v56, %v2176_v26 }
 0x1dd   : > { %v1179_v57 = vpop.f32.mrf.mxu2  ;;  %v860_v59 = vpop.f32.mrf.mxu0 }
 0x1de   : > { %v1212_v58 = vadd.f32 %v1179_v57, %v1003_v55  ;;  %v1005_v60 = vpop.f32.mrf.mxu1 }
 0x1df   : > { %v1006_v4 = vadd.f32 %v1005_v60, %v860_v59 }
 0x1e0   : > { %v1228_v62 = vmax.f32 %v1212_v58, 0.0 }
 0x1e2   : > { %v1699_v63 = vpack.c.bf16 %v1228_v62, %v1227_v61 }
 0x1e3   : > { %v1025_v0 = vpop.f32.mrf.mxu3 }
 0x1e4   : > { %1727 = vst [vmem:[%s2031_s27 + $0x10] sm:$0xff] %v1699_v63   ;;  %v1026_v42 = vadd.f32 %v1025_v0, %v2179_v34 }
 0x1e5   : > { %v1182_v1 = vpop.f32.mrf.mxu2  ;;  %v862_v2 = vpop.f32.mrf.mxu0 }
 0x1e6   : > { %v1007_v3 = vpop.f32.mrf.mxu1  ;;  %v1213_v5 = vadd.f32 %v1182_v1, %v1006_v4 }
 0x1e7   : > { %v1008_v6 = vadd.f32 %v1007_v3, %v862_v2 }
 0x1e8   : > { %v1229_v12 = vmax.f32 %v1213_v5, 0.0 }
 0x1eb   : > { %v1027_v7 = vpop.f32.mrf.mxu3 }
 0x1ec   : > { %v1028_v45 = vadd.f32 %v1027_v7, %v2181_v41 }
 0x1ed   : > { %v1184_v8 = vpop.f32.mrf.mxu2  ;;  %v865_v10 = vpop.f32.mrf.mxu0 }
 0x1ee   : > { %v1214_v9 = vadd.f32 %v1184_v8, %v1008_v6  ;;  %v1010_v11 = vpop.f32.mrf.mxu1 }
 0x1ef   : > { %v1011_v20 = vadd.f32 %v1010_v11, %v865_v10 }
 0x1f0   : > { %v1230_v13 = vmax.f32 %v1214_v9, 0.0 }
 0x1f2   : > { %v1704_v14 = vpack.c.bf16 %v1230_v13, %v1229_v12 }
 0x1f3   : > { %v1197_v15 = vpop.f32.mrf.mxu3 }
 0x1f4   : > { %1728 = vst [vmem:[%s2031_s27 + $0x18] sm:$0xff] %v1704_v14   ;;  %v1219_v23 = vadd.f32 %v1197_v15, %v1021_v21 }
 0x1f5   : > { %v1187_v16 = vpop.f32.mrf.mxu2  ;;  %v867_v17 = vpop.f32.mrf.mxu0 }
 0x1f6   : > { %v1012_v18 = vpop.f32.mrf.mxu1  ;;  %v1215_v24 = vadd.f32 %v1187_v16, %v1011_v20  ;;  %v1235_v31 = vmax.f32 %v1219_v23, 0.0 }
 0x1f7   : > { %v1013_v25 = vadd.f32 %v1012_v18, %v867_v17 }
 0x1f8   : > { %v1231_v36 = vmax.f32 %v1215_v24, 0.0 }
 0x1fb   : > { %v1199_v27 = vpop.f32.mrf.mxu3 }
 0x1fc   : > { %v1220_v29 = vadd.f32 %v1199_v27, %v1023_v22 }
 0x1fd   : > { %v1189_v28 = vpop.f32.mrf.mxu2  ;;  %v870_v33 = vpop.f32.mrf.mxu0 }
 0x1fe   : > { %v1216_v30 = vadd.f32 %v1189_v28, %v1013_v25  ;;  %v1236_v32 = vmax.f32 %v1220_v29, 0.0  ;;  %v1015_v35 = vpop.f32.mrf.mxu1 }
 0x1ff   : > { %v1016_v40 = vadd.f32 %v1015_v35, %v870_v33 }
 0x200   : > { %v1232_v37 = vmax.f32 %v1216_v30, 0.0  ;;  %v1719_v38 = vpack.c.bf16 %v1236_v32, %v1235_v31 }
 0x202   : > { %v1709_v39 = vpack.c.bf16 %v1232_v37, %v1231_v36  ;;  %1731 = vst [vmem:[%s2031_s27 + $0x30] sm:$0xff] %v1719_v38  }
 0x203   : > { %v1202_v19 = vpop.f32.mrf.mxu3 }
 0x204   : > { %1729 = vst [vmem:[%s2031_s27 + $0x20] sm:$0xff] %v1709_v39   ;;  %v1221_v46 = vadd.f32 %v1202_v19, %v1026_v42 }
 0x205   : > { %v1192_v26 = vpop.f32.mrf.mxu2  ;;  %v872_v43 = vpop.f32.mrf.mxu0 }
 0x206   : > { %v1017_v44 = vpop.f32.mrf.mxu1  ;;  %v1217_v47 = vadd.f32 %v1192_v26, %v1016_v40  ;;  %v1237_v53 = vmax.f32 %v1221_v46, 0.0 }
 0x207   : > { %v1018_v48 = vadd.f32 %v1017_v44, %v872_v43 }
 0x208   : > { %v1233_v55 = vmax.f32 %v1217_v47, 0.0 }
 0x20b   : > { %v1204_v49 = vpop.f32.mrf.mxu3 }
 0x20c   : > { %v1222_v51 = vadd.f32 %v1204_v49, %v1028_v45 }
 0x20d   : > { %v1194_v50 = vpop.f32.mrf.mxu2 }
 0x20e   : > { %v1218_v52 = vadd.f32 %v1194_v50, %v1018_v48  ;;  %v1238_v54 = vmax.f32 %v1222_v51, 0.0 }
 0x210   : > { %v1234_v56 = vmax.f32 %v1218_v52, 0.0  ;;  %v1724_v57 = vpack.c.bf16 %v1238_v54, %v1237_v53 }
 0x212   : > { %v1714_v58 = vpack.c.bf16 %v1234_v56, %v1233_v55  ;;  %1732 = vst [vmem:[%s2031_s27 + $0x38] sm:$0xff] %v1724_v57  }
 0x214   : > { %1730 = vst [vmem:[%s2031_s27 + $0x28] sm:$0xff] %v1714_v58  }
 0x215 PF: > { %s17_s30 = sadd.s32 1, %s1892_s30   ;;  %s2225_s24 = smov %s1872_s25 }
 0x216   : > { %p14_p0 = scmp.ge.s32.totalorder %s17_s30, 6   ;;  %s2226_s25 = smov %s1986_s14 }
 0x217   : > { %s2227_s26 = smov %s1884_s28  ;;  %s2228_s27 = smov %s1888_s29 }
 0x218   : > { %s2229_s28 = smov %s2232_s8  ;;  %s2230_s29 = smov %s2236_s9 }
 0x219   :  { %16 = sbr.rel (!%p14_p0) target bundleno = 6 (0x6), region = 141 }

</bundles_post_ra>
